<compile_context>
chip_gen: v6e
topology: v6e:2x2x1
jax: 0.10.0
libtpu: 0.0.40
codegen_flags: <defaults>
</compile_context>

<pallas_src>
import math

import jax
import jax.numpy as jnp
from jax.experimental import pallas as pl
from jax.experimental.pallas import tpu as pltpu


def _pick_strip_rows(h, w, c, max_block_bytes=2 << 20):
    """Rows per strip: the largest divisor TH of H with a sublane-aligned strip
    (TH*W % 8 == 0) whose f32 output block (TH*W, 4C) stays under ~2 MiB, while
    keeping >= 2 strips per image for DMA/compute overlap.  Falls back to the full
    image (block == full dims is always legal) if H has no usable divisor."""
    row_bytes = w * 4 * c * 4                      # f32 bytes of one base row's 4-phase output
    candidates = [th for th in range(1, h) if h % th == 0 and (th * w) % 8 == 0]
    if not candidates:
        return h                                   # single strip; no intra-image pipelining
    fitting = [th for th in candidates if th * row_bytes <= max_block_bytes]
    return max(fitting) if fitting else min(candidates)


def _make_upsample_conv_kernel(h, w, c, th):
    def kernel(x_ref, w_ref, b_ref, o_ref):
        # x_ref: (1, H, W, C)    bf16  full image, resident across the strip axis
        # w_ref: (9, C, 4*C)     bf16  polyphase weights, tap-major (t = ry*3 + rx)
        # b_ref: (1, 4*C)        f32   bias replicated over the 4 phases
        # o_ref: (1, TH*W, 4*C)  f32   strip output: rows = i*W + j, cols = (p, q, cout)
        s = pl.program_id(1)
        last = pl.num_programs(1) - 1
        r0 = pl.multiple_of(s * th, th)

        # ---- per-strip fused zero padding (no full padded image anywhere) --------
        core = x_ref[0, pl.ds(r0, th)]                               # (TH, W, C)
        top = x_ref[0, pl.ds(jnp.maximum(r0 - 1, 0), 1)]             # (1, W, C) clamped
        bot = x_ref[0, pl.ds(jnp.minimum(r0 + th, h - 1), 1)]        # (1, W, C) clamped
        top = jnp.where(s > 0, top, jnp.zeros_like(top))             # zero above row 0
        bot = jnp.where(s < last, bot, jnp.zeros_like(bot))          # zero below row H-1
        rows = jnp.concatenate([top, core, bot], axis=0)             # (TH+2, W, C)
        zcol = jnp.zeros((th + 2, 1, c), rows.dtype)
        win = jnp.concatenate([zcol, rows, zcol], axis=1)            # (TH+2, W+2, C)

        # ---- 9 accumulated K=C matmuls (no 9-way lane concat / im2col buffer) ----
        acc = None
        for t in range(9):
            ry, rx = divmod(t, 3)
            tap = win[ry:ry + th, rx:rx + w, :].reshape(th * w, c)   # (TH*W, C) bf16
            d = jnp.dot(tap, w_ref[t], preferred_element_type=jnp.float32)
            acc = d if acc is None else acc + d
        acc = acc + b_ref[...]                                       # (1, 4C) broadcasts
        o_ref[0] = acc.astype(o_ref.dtype)

    return kernel


def upsample_forward(x_nchw, w_oihw, b):
    """Equivalent of Upsample(channels).forward(x) for NCHW float32 input."""
    n, c, h, w_sp = x_nchw.shape
    th = _pick_strip_rows(h, w_sp, c)
    n_strips = h // th

    # ---- interface glue -------------------------------------------------------
    # TODO(synk): if the surrounding model stays NHWC end-to-end, this transpose and
    # the output permute below disappear entirely (kernel would consume/produce NHWC).
    x_nhwc = jnp.transpose(x_nchw, (0, 2, 3, 1)).astype(jnp.bfloat16)   # (N, H, W, C) bf16

    # ---- fold conv weights into polyphase form (tap-major: (9, C, 4C)) --------
    # y[2i+p, 2j+q, co] = sum_{ry,rx} Wall[ry, rx, :, p, q, :] . xp[i+ry, j+rx, :]
    # with xp = x zero-padded by 1 (polyphase decomposition of conv3x3 o nearest2x).
    w_hwio = jnp.transpose(w_oihw, (2, 3, 1, 0)).astype(jnp.float32)    # (3,3,Ci,Co)
    row_map = ((0, 1, 1), (0, 0, 1))          # [phase][conv tap] -> 2x2 window offset
    wall = jnp.zeros((3, 3, c, 2, 2, c), jnp.float32)    # (ry, rx, ci, p, q, co)
    for p in range(2):
        for q in range(2):
            for dy in range(3):
                for dx in range(3):
                    ry = p + row_map[p][dy]
                    rx = q + row_map[q][dx]
                    wall = wall.at[ry, rx, :, p, q, :].add(w_hwio[dy, dx])
    wall = wall.reshape(9, c, 4 * c).astype(jnp.bfloat16)
    bias4 = jnp.tile(b.astype(jnp.float32), 4).reshape(1, 4 * c)

    # ---- VMEM budget (v7x has 64 MiB physical; ask only for what we need) -----
    x_blk = h * w_sp * c * 2                       # bf16 image block
    out_blk = th * w_sp * 4 * c * 4                # f32 strip output block
    w_bytes = 9 * c * 4 * c * 2
    win_bytes = (th + 2) * (w_sp + 2) * c * 2
    est = 2 * x_blk + 2 * out_blk + 2 * w_bytes + 4 * out_blk + 2 * win_bytes + (1 << 20)
    vmem_limit = int(min(max(est, 32 << 20), 96 << 20))

    cost = pl.CostEstimate(
        flops=2 * n * h * w_sp * (9 * c) * (4 * c),
        transcendentals=0,
        bytes_accessed=(n * h * w_sp * c * 2            # x (bf16)
                        + 9 * c * 4 * c * 2 + 4 * c * 4  # weights + bias
                        + n * h * w_sp * 4 * c * 4),     # 4x-upsampled output (f32)
    )

    # ---- Pallas kernel: grid = (batch, row strips), both parallel --------------
    kernel = _make_upsample_conv_kernel(h, w_sp, c, th)
    out_k = pl.pallas_call(
        kernel,
        out_shape=jax.ShapeDtypeStruct((n, h * w_sp, 4 * c), x_nchw.dtype),
        grid_spec=pltpu.PrefetchScalarGridSpec(
            num_scalar_prefetch=0,
            grid=(n, n_strips),
            in_specs=[
                pl.BlockSpec((1, h, w_sp, c), lambda bi, si: (bi, 0, 0, 0)),
                pl.BlockSpec((9, c, 4 * c), lambda bi, si: (0, 0, 0)),
                pl.BlockSpec((1, 4 * c), lambda bi, si: (0, 0)),
            ],
            out_specs=pl.BlockSpec((1, th * w_sp, 4 * c),
                                   lambda bi, si: (bi, si, 0)),
        ),
        compiler_params=pltpu.CompilerParams(
            dimension_semantics=("parallel", "parallel"),
            vmem_limit_bytes=vmem_limit,
        ),
        cost_estimate=cost,
    )(x_nhwc, wall, bias4)

    # out_k[n, i*W + j, (p*2+q)*C + co]  ->  y[n, co, 2i+p, 2j+q]
    # (single permute; required anyway by the NCHW interface)
    out6 = out_k.reshape(n, h, w_sp, 2, 2, c)              # (n, i, j, p, q, co)
    out = jnp.transpose(out6, (0, 5, 1, 3, 2, 4))          # (n, co, i, p, j, q)
    return out.reshape(n, c, 2 * h, 2 * w_sp)


if __name__ == "__main__":
    key = jax.random.PRNGKey(0)
    k_x, k_w, k_b = jax.random.split(key, 3)

    N, C, H, W = 2, 4, 16, 16
    x = jax.random.normal(k_x, (N, C, H, W), jnp.float32)

    # nn.Conv2d(C, C, 3) default init: U(-bound, bound), bound = 1/sqrt(C*3*3)
    fan_in = C * 3 * 3
    bound = 1.0 / math.sqrt(fan_in)
    w = jax.random.uniform(k_w, (C, C, 3, 3), jnp.float32, -bound, bound)   # OIHW
    b = jax.random.uniform(k_b, (C,), jnp.float32, -bound, bound)

    fwd = jax.jit(upsample_forward)
    out = jax.block_until_ready(fwd(x, w, b))
    assert out.shape == (N, C, 2 * H, 2 * W), out.shape

    # Reference (f32): XLA nearest-2x upsample + 'SAME' 3x3 conv.
    x_nhwc = jnp.transpose(x, (0, 2, 3, 1))
    up = jnp.repeat(jnp.repeat(x_nhwc, 2, axis=1), 2, axis=2)
    ref = jax.lax.conv_general_dilated(
        up, jnp.transpose(w, (2, 3, 1, 0)), (1, 1), "SAME",
        dimension_numbers=("NHWC", "HWIO", "NHWC")) + b
    ref = jnp.transpose(ref, (0, 3, 1, 2))
    err = float(jnp.max(jnp.abs(out - ref)))
    # bf16 activations/weights on the MXU with f32 accumulation -> relaxed tolerance.
    assert jnp.allclose(out, ref, atol=3e-2, rtol=3e-2), err

    print("KERNEL_OK")
</pallas_src>

<mosaic_0001>
module attributes {stable_mosaic.version = 11 : i64} {
  func.func @kernel(%arg0: i32, %arg1: i32, %arg2: memref<1x16x16x4xbf16, #tpu.memory_space<vmem>>, %arg3: memref<9x4x16xbf16, #tpu.memory_space<vmem>>, %arg4: memref<1x16xf32, #tpu.memory_space<vmem>>, %arg5: memref<1x128x16xf32, #tpu.memory_space<vmem>>) attributes {dimension_semantics = [#tpu.dimension_semantics<parallel>, #tpu.dimension_semantics<parallel>], iteration_bounds = array<i64: 2, 2>, scalar_prefetch = 0 : i64, scratch_operands = 0 : i64, tpu.core_type = #tpu.core_type<tc>, window_params = [{transform_indices = @transform_0, window_bounds = array<i64: 1, 16, 16, 4>}, {pipeline_mode = #tpu.pipeline_mode<synchronous>, transform_indices = @transform_1, window_bounds = array<i64: 9, 4, 16>}, {pipeline_mode = #tpu.pipeline_mode<synchronous>, transform_indices = @transform_2, window_bounds = array<i64: 1, 16>}, {transform_indices = @transform_3, window_bounds = array<i64: 1, 128, 16>}]} {
    %c8_i32 = arith.constant 8 : i32
    %0 = arith.muli %arg1, %c8_i32 : i32
    %1 = tpu.assume_multiple %0, 8 : i32
    %c0 = arith.constant 0 : index
    %2 = arith.index_cast %1 : i32 to index
    %c0_0 = arith.constant 0 : index
    %c0_1 = arith.constant 0 : index
    %3 = vector.load %arg2[%c0, %2, %c0_0, %c0_1] : memref<1x16x16x4xbf16, #tpu.memory_space<vmem>>, vector<1x8x16x4xbf16>
    %4 = vector.shape_cast %3 : vector<1x8x16x4xbf16> to vector<8x16x4xbf16>
    %c1_i32 = arith.constant 1 : i32
    %5 = arith.subi %1, %c1_i32 : i32
    %c0_i32 = arith.constant 0 : i32
    %6 = arith.maxsi %5, %c0_i32 : i32
    %c0_2 = arith.constant 0 : index
    %7 = arith.index_cast %6 : i32 to index
    %c0_3 = arith.constant 0 : index
    %c0_4 = arith.constant 0 : index
    %8 = vector.load %arg2[%c0_2, %7, %c0_3, %c0_4] : memref<1x16x16x4xbf16, #tpu.memory_space<vmem>>, vector<1x1x16x4xbf16>
    %9 = vector.shape_cast %8 : vector<1x1x16x4xbf16> to vector<1x16x4xbf16>
    %c8_i32_5 = arith.constant 8 : i32
    %10 = arith.addi %1, %c8_i32_5 : i32
    %c15_i32 = arith.constant 15 : i32
    %11 = arith.minsi %10, %c15_i32 : i32
    %c0_6 = arith.constant 0 : index
    %12 = arith.index_cast %11 : i32 to index
    %c0_7 = arith.constant 0 : index
    %c0_8 = arith.constant 0 : index
    %13 = vector.load %arg2[%c0_6, %12, %c0_7, %c0_8] : memref<1x16x16x4xbf16, #tpu.memory_space<vmem>>, vector<1x1x16x4xbf16>
    %14 = vector.shape_cast %13 : vector<1x1x16x4xbf16> to vector<1x16x4xbf16>
    %c0_i32_9 = arith.constant 0 : i32
    %15 = arith.cmpi sgt, %arg1, %c0_i32_9 : i32
    %cst = arith.constant 0.000000e+00 : bf16
    %16 = vector.broadcast %cst : bf16 to vector<1x16x4xbf16>
    %17 = arith.select %15, %9, %16 : vector<1x16x4xbf16>
    %c1_i32_10 = arith.constant 1 : i32
    %18 = arith.cmpi slt, %arg1, %c1_i32_10 : i32
    %cst_11 = arith.constant 0.000000e+00 : bf16
    %19 = vector.broadcast %cst_11 : bf16 to vector<1x16x4xbf16>
    %20 = arith.select %18, %14, %19 : vector<1x16x4xbf16>
    %21 = tpu.concatenate %17, %4, %20 in 0 : vector<1x16x4xbf16>, vector<8x16x4xbf16>, vector<1x16x4xbf16> -> vector<10x16x4xbf16>
    %cst_12 = arith.constant 0.000000e+00 : bf16
    %22 = vector.broadcast %cst_12 : bf16 to vector<10x1x4xbf16>
    %23 = tpu.concatenate %22, %21, %22 in 1 : vector<10x1x4xbf16>, vector<10x16x4xbf16>, vector<10x1x4xbf16> -> vector<10x18x4xbf16>
    %24 = vector.extract_strided_slice %23 {offsets = [0, 0, 0], sizes = [8, 16, 4], strides = [1, 1, 1]} : vector<10x18x4xbf16> to vector<8x16x4xbf16>
    %25 = vector.shape_cast %24 : vector<8x16x4xbf16> to vector<128x4xbf16>
    %c0_13 = arith.constant 0 : index
    %c0_14 = arith.constant 0 : index
    %c0_15 = arith.constant 0 : index
    %26 = vector.load %arg3[%c0_13, %c0_14, %c0_15] : memref<9x4x16xbf16, #tpu.memory_space<vmem>>, vector<1x4x16xbf16>
    %27 = vector.shape_cast %26 : vector<1x4x16xbf16> to vector<4x16xbf16>
    %cst_16 = arith.constant dense<0.000000e+00> : vector<128x16xf32>
    %28 = tpu.matmul %25, %27, %cst_16 {dimension_numbers = #tpu.dot_dimension_numbers<[1], [0], [0], [1], [0, 0, 1, 1], [], []>} : vector<128x4xbf16>, vector<4x16xbf16>, vector<128x16xf32> -> vector<128x16xf32>
    %29 = vector.extract_strided_slice %23 {offsets = [0, 1, 0], sizes = [8, 16, 4], strides = [1, 1, 1]} : vector<10x18x4xbf16> to vector<8x16x4xbf16>
    %30 = vector.shape_cast %29 : vector<8x16x4xbf16> to vector<128x4xbf16>
    %c1 = arith.constant 1 : index
    %c0_17 = arith.constant 0 : index
    %c0_18 = arith.constant 0 : index
    %31 = vector.load %arg3[%c1, %c0_17, %c0_18] : memref<9x4x16xbf16, #tpu.memory_space<vmem>>, vector<1x4x16xbf16>
    %32 = vector.shape_cast %31 : vector<1x4x16xbf16> to vector<4x16xbf16>
    %cst_19 = arith.constant dense<0.000000e+00> : vector<128x16xf32>
    %33 = tpu.matmul %30, %32, %cst_19 {dimension_numbers = #tpu.dot_dimension_numbers<[1], [0], [0], [1], [0, 0, 1, 1], [], []>} : vector<128x4xbf16>, vector<4x16xbf16>, vector<128x16xf32> -> vector<128x16xf32>
    %34 = arith.addf %28, %33 : vector<128x16xf32>
    %35 = vector.extract_strided_slice %23 {offsets = [0, 2, 0], sizes = [8, 16, 4], strides = [1, 1, 1]} : vector<10x18x4xbf16> to vector<8x16x4xbf16>
    %36 = vector.shape_cast %35 : vector<8x16x4xbf16> to vector<128x4xbf16>
    %c2 = arith.constant 2 : index
    %c0_20 = arith.constant 0 : index
    %c0_21 = arith.constant 0 : index
    %37 = vector.load %arg3[%c2, %c0_20, %c0_21] : memref<9x4x16xbf16, #tpu.memory_space<vmem>>, vector<1x4x16xbf16>
    %38 = vector.shape_cast %37 : vector<1x4x16xbf16> to vector<4x16xbf16>
    %cst_22 = arith.constant dense<0.000000e+00> : vector<128x16xf32>
    %39 = tpu.matmul %36, %38, %cst_22 {dimension_numbers = #tpu.dot_dimension_numbers<[1], [0], [0], [1], [0, 0, 1, 1], [], []>} : vector<128x4xbf16>, vector<4x16xbf16>, vector<128x16xf32> -> vector<128x16xf32>
    %40 = arith.addf %34, %39 : vector<128x16xf32>
    %41 = vector.extract_strided_slice %23 {offsets = [1, 0, 0], sizes = [8, 16, 4], strides = [1, 1, 1]} : vector<10x18x4xbf16> to vector<8x16x4xbf16>
    %42 = vector.shape_cast %41 : vector<8x16x4xbf16> to vector<128x4xbf16>
    %c3 = arith.constant 3 : index
    %c0_23 = arith.constant 0 : index
    %c0_24 = arith.constant 0 : index
    %43 = vector.load %arg3[%c3, %c0_23, %c0_24] : memref<9x4x16xbf16, #tpu.memory_space<vmem>>, vector<1x4x16xbf16>
    %44 = vector.shape_cast %43 : vector<1x4x16xbf16> to vector<4x16xbf16>
    %cst_25 = arith.constant dense<0.000000e+00> : vector<128x16xf32>
    %45 = tpu.matmul %42, %44, %cst_25 {dimension_numbers = #tpu.dot_dimension_numbers<[1], [0], [0], [1], [0, 0, 1, 1], [], []>} : vector<128x4xbf16>, vector<4x16xbf16>, vector<128x16xf32> -> vector<128x16xf32>
    %46 = arith.addf %40, %45 : vector<128x16xf32>
    %47 = vector.extract_strided_slice %23 {offsets = [1, 1, 0], sizes = [8, 16, 4], strides = [1, 1, 1]} : vector<10x18x4xbf16> to vector<8x16x4xbf16>
    %48 = vector.shape_cast %47 : vector<8x16x4xbf16> to vector<128x4xbf16>
    %c4 = arith.constant 4 : index
    %c0_26 = arith.constant 0 : index
    %c0_27 = arith.constant 0 : index
    %49 = vector.load %arg3[%c4, %c0_26, %c0_27] : memref<9x4x16xbf16, #tpu.memory_space<vmem>>, vector<1x4x16xbf16>
    %50 = vector.shape_cast %49 : vector<1x4x16xbf16> to vector<4x16xbf16>
    %cst_28 = arith.constant dense<0.000000e+00> : vector<128x16xf32>
    %51 = tpu.matmul %48, %50, %cst_28 {dimension_numbers = #tpu.dot_dimension_numbers<[1], [0], [0], [1], [0, 0, 1, 1], [], []>} : vector<128x4xbf16>, vector<4x16xbf16>, vector<128x16xf32> -> vector<128x16xf32>
    %52 = arith.addf %46, %51 : vector<128x16xf32>
    %53 = vector.extract_strided_slice %23 {offsets = [1, 2, 0], sizes = [8, 16, 4], strides = [1, 1, 1]} : vector<10x18x4xbf16> to vector<8x16x4xbf16>
    %54 = vector.shape_cast %53 : vector<8x16x4xbf16> to vector<128x4xbf16>
    %c5 = arith.constant 5 : index
    %c0_29 = arith.constant 0 : index
    %c0_30 = arith.constant 0 : index
    %55 = vector.load %arg3[%c5, %c0_29, %c0_30] : memref<9x4x16xbf16, #tpu.memory_space<vmem>>, vector<1x4x16xbf16>
    %56 = vector.shape_cast %55 : vector<1x4x16xbf16> to vector<4x16xbf16>
    %cst_31 = arith.constant dense<0.000000e+00> : vector<128x16xf32>
    %57 = tpu.matmul %54, %56, %cst_31 {dimension_numbers = #tpu.dot_dimension_numbers<[1], [0], [0], [1], [0, 0, 1, 1], [], []>} : vector<128x4xbf16>, vector<4x16xbf16>, vector<128x16xf32> -> vector<128x16xf32>
    %58 = arith.addf %52, %57 : vector<128x16xf32>
    %59 = vector.extract_strided_slice %23 {offsets = [2, 0, 0], sizes = [8, 16, 4], strides = [1, 1, 1]} : vector<10x18x4xbf16> to vector<8x16x4xbf16>
    %60 = vector.shape_cast %59 : vector<8x16x4xbf16> to vector<128x4xbf16>
    %c6 = arith.constant 6 : index
    %c0_32 = arith.constant 0 : index
    %c0_33 = arith.constant 0 : index
    %61 = vector.load %arg3[%c6, %c0_32, %c0_33] : memref<9x4x16xbf16, #tpu.memory_space<vmem>>, vector<1x4x16xbf16>
    %62 = vector.shape_cast %61 : vector<1x4x16xbf16> to vector<4x16xbf16>
    %cst_34 = arith.constant dense<0.000000e+00> : vector<128x16xf32>
    %63 = tpu.matmul %60, %62, %cst_34 {dimension_numbers = #tpu.dot_dimension_numbers<[1], [0], [0], [1], [0, 0, 1, 1], [], []>} : vector<128x4xbf16>, vector<4x16xbf16>, vector<128x16xf32> -> vector<128x16xf32>
    %64 = arith.addf %58, %63 : vector<128x16xf32>
    %65 = vector.extract_strided_slice %23 {offsets = [2, 1, 0], sizes = [8, 16, 4], strides = [1, 1, 1]} : vector<10x18x4xbf16> to vector<8x16x4xbf16>
    %66 = vector.shape_cast %65 : vector<8x16x4xbf16> to vector<128x4xbf16>
    %c7 = arith.constant 7 : index
    %c0_35 = arith.constant 0 : index
    %c0_36 = arith.constant 0 : index
    %67 = vector.load %arg3[%c7, %c0_35, %c0_36] : memref<9x4x16xbf16, #tpu.memory_space<vmem>>, vector<1x4x16xbf16>
    %68 = vector.shape_cast %67 : vector<1x4x16xbf16> to vector<4x16xbf16>
    %cst_37 = arith.constant dense<0.000000e+00> : vector<128x16xf32>
    %69 = tpu.matmul %66, %68, %cst_37 {dimension_numbers = #tpu.dot_dimension_numbers<[1], [0], [0], [1], [0, 0, 1, 1], [], []>} : vector<128x4xbf16>, vector<4x16xbf16>, vector<128x16xf32> -> vector<128x16xf32>
    %70 = arith.addf %64, %69 : vector<128x16xf32>
    %71 = vector.extract_strided_slice %23 {offsets = [2, 2, 0], sizes = [8, 16, 4], strides = [1, 1, 1]} : vector<10x18x4xbf16> to vector<8x16x4xbf16>
    %72 = vector.shape_cast %71 : vector<8x16x4xbf16> to vector<128x4xbf16>
    %c8 = arith.constant 8 : index
    %c0_38 = arith.constant 0 : index
    %c0_39 = arith.constant 0 : index
    %73 = vector.load %arg3[%c8, %c0_38, %c0_39] : memref<9x4x16xbf16, #tpu.memory_space<vmem>>, vector<1x4x16xbf16>
    %74 = vector.shape_cast %73 : vector<1x4x16xbf16> to vector<4x16xbf16>
    %cst_40 = arith.constant dense<0.000000e+00> : vector<128x16xf32>
    %75 = tpu.matmul %72, %74, %cst_40 {dimension_numbers = #tpu.dot_dimension_numbers<[1], [0], [0], [1], [0, 0, 1, 1], [], []>} : vector<128x4xbf16>, vector<4x16xbf16>, vector<128x16xf32> -> vector<128x16xf32>
    %76 = arith.addf %70, %75 : vector<128x16xf32>
    %c0_41 = arith.constant 0 : index
    %c0_42 = arith.constant 0 : index
    %77 = vector.load %arg4[%c0_41, %c0_42] : memref<1x16xf32, #tpu.memory_space<vmem>>, vector<1x16xf32>
    %78 = vector.broadcast %77 : vector<1x16xf32> to vector<128x16xf32>
    %79 = arith.addf %76, %78 : vector<128x16xf32>
    %c0_43 = arith.constant 0 : index
    %c0_44 = arith.constant 0 : index
    %c0_45 = arith.constant 0 : index
    %80 = vector.load %arg5[%c0_43, %c0_44, %c0_45] : memref<1x128x16xf32, #tpu.memory_space<vmem>>, vector<1x128x16xf32>
    %81 = vector.shape_cast %80 : vector<1x128x16xf32> to vector<128x16xf32>
    %82 = vector.shape_cast %79 : vector<128x16xf32> to vector<1x128x16xf32>
    tpu.vector_store %arg5[%c0_43, %c0_44, %c0_45], %82 {strides = array<i32>} : memref<1x128x16xf32, #tpu.memory_space<vmem>>, vector<1x128x16xf32>,
    return
  }
  func.func @transform_0(%arg0: i32, %arg1: i32) -> (i32, i32, i32, i32) {
    %c0_i32 = arith.constant 0 : i32
    %c0_i32_0 = arith.constant 0 : i32
    %c0_i32_1 = arith.constant 0 : i32
    %c0_i32_2 = arith.constant 0 : i32
    return %arg0, %c0_i32, %c0_i32_0, %c0_i32_1 : i32, i32, i32, i32
  }
  func.func @transform_1(%arg0: i32, %arg1: i32) -> (i32, i32, i32) {
    %c0_i32 = arith.constant 0 : i32
    %c0_i32_0 = arith.constant 0 : i32
    %c0_i32_1 = arith.constant 0 : i32
    %c0_i32_2 = arith.constant 0 : i32
    return %c0_i32, %c0_i32_0, %c0_i32_1 : i32, i32, i32
  }
  func.func @transform_2(%arg0: i32, %arg1: i32) -> (i32, i32) {
    %c0_i32 = arith.constant 0 : i32
    %c0_i32_0 = arith.constant 0 : i32
    %c0_i32_1 = arith.constant 0 : i32
    return %c0_i32, %c0_i32_0 : i32, i32
  }
  func.func @transform_3(%arg0: i32, %arg1: i32) -> (i32, i32, i32) {
    %c0_i32 = arith.constant 0 : i32
    %c0_i32_0 = arith.constant 0 : i32
    return %arg0, %arg1, %c0_i32 : i32, i32, i32
  }
}

</mosaic_0001>

<bundles_post_ra>
// kernel: tile.8
= control target key start
LH: loop header
LB: loop body
LE: loop exit
PB: predicated region body
PF: predicated region fallthrough
CT: control target
= control target key end

     0   :  { %s22_s0 = inlined_call_operand.vmem [shape: f32[4], index: 0, kind: input, shape index: {}]   ;;  %s23_s1 = inlined_call_operand.vmem [shape: f32[4,4], index: 1, kind: output, shape index: {}]  }
   0x1   :  { %v4_v0 = vld [vmem:[%s22_s0] ss:$0 sm:$0xff] }
   0x2   :  { %5 = vst [vmem:[%s23_s1] sm:$0xf] %v4_v0 }

// kernel: tile.9
= control target key start
LH: loop header
LB: loop body
LE: loop exit
PB: predicated region body
PF: predicated region fallthrough
CT: control target
= control target key end

     0   :  { %vm8_vm0 = vcmask 31744   ;;  %s40_s8 = smov 4   ;;  %s41_s9 = smov 8   ;;  %vm14_vm1 = vcmask 130144   ;;  %vm20_vm2 = vcmask 97344   ;;  %vm26_vm3 = vcmask 64544   ;;  %s58_s0 = inlined_call_operand.vmem [shape: f32[4,4], index: 0, kind: input, shape index: {}]   ;;  %s59_s1 = inlined_call_operand.vmem [shape: f32[1,16], index: 1, kind: output, shape index: {}]  }
   0x1   :  { %v5_v0 = vld [vmem:[%s58_s0] sm:$0xf]  ;;  %s39_s0 = smov 12  }
   0x2   :  { %6 = vst [vmem:[#allocation1] sm:$0xf] %v5_v0 }
   0x9   :  { %v11_v1 = vld [vmem:[#allocation1 + $0x3] sm:$0x1]   ;;  %v23_v2 = vld [vmem:[#allocation1 + $0x1] sm:$0x1]   ;;  %v7_v3 = vld [vmem:[#allocation1] sm:$0x1]  }
   0xa   :  { %12 = vrot.lane.b32.xlu0 %v11_v1, %s39_s0  ;;  %24 = vrot.lane.b32.xlu1 %v23_v2, %s40_s8  ;;  %v17_v4 = vld [vmem:[#allocation1 + $0x2] sm:$0x1]   ;;  %9 = vst.msk [vmem:[#allocation0] sm:$0x1] %vm8_vm0, %v7_v3  }
   0xe   :  { %18 = vrot.lane.b32.xlu0 %v17_v4, %s41_s9 }
  0x7c   :  { %v13_v5 = vpop.permute.xlu0 %12   ;;  %v25_v6 = vpop.permute.xlu1 %24  }
  0x7d   :  { %15 = vst.msk [vmem:[#allocation0] sm:$0x1] %vm14_vm1, %v13_v5  }
  0x80   :  { %v19_v7 = vpop.permute.xlu0 %18  }
  0x81   :  { %21 = vst.msk [vmem:[#allocation0] sm:$0x1] %vm20_vm2, %v19_v7  }
  0x82   :  { %27 = vst.msk [vmem:[#allocation0] sm:$0x1] %vm26_vm3, %v25_v6  }
  0x89   :  { %v32_v8 = vld [vmem:[#allocation0] sm:$0x1] }
  0x8a   :  { %35 = vst [vmem:[%s59_s1] sm:$0x1] %v32_v8 }

// kernel: upsample_forward.1
= control target key start
LH: loop header
LB: loop body
LE: loop exit
PB: predicated region body
PF: predicated region fallthrough
CT: control target
= control target key end

     0   :  { %s2298_s12 = smov 0   ;;  %s2300_s13 = smov 0   ;;  %s3024_s0 = inlined_call_operand.vmem [shape: bf16[2,16,16,4], index: 0, kind: input, shape index: {}]   ;;  %s3025_s1 = inlined_call_operand.vmem [shape: bf16[9,4,16], index: 1, kind: input, shape index: {}]   ;;  %s3026_s2 = inlined_call_operand.vmem [shape: f32[1,16], index: 2, kind: input, shape index: {}]   ;;  %s3027_s3 = inlined_call_operand.vmem [shape: f32[2,256,16], index: 3, kind: output, shape index: {}]  }
   0x1   :  { %s2302_s14 = smov 0   ;;  %s2304_s15 = smov 0  }
   0x2   :  { %s2306_s16 = smov 0  }
   0x3 LB: > { %s22_s17 = sadd.s32 1, %s2268_s14  ;;  %s25_s18 = sadd.s32 1, %s2272_s15  ;;  %s2276_s16 = sphi %s2306_s16, %s13_s16   ;;  %s2272_s15 = sphi %s2304_s15, %s3071_s15   ;;  %s2268_s14 = sphi %s2302_s14, %s3070_s14   ;;  %s2264_s13 = sphi %s2300_s13, %s3069_s13   ;;  %s2260_s12 = sphi %s2298_s12, %s3068_s12  }
   0x4   : > { %p23_p0 = scmp.ge.s32.totalorder %s22_s17, 2  ;;  %p1823_p1 = scmp.ge.s32.totalorder %s2276_s16, 1 }
   0x5   : > { %p151_p2 = scmp.lt.s32.totalorder %s2276_s16, 5 }
   0x6   : > { %s3073_s17 = smov (%p23_p0, %s22_s17), 0  ;;  %s3075_s18 = smov (!%p23_p0, %s25_s18), %s2272_s15 }
   0x7   : > { %p152_p3 = pnand %p1823_p1, %p151_p2  ;;  %p27_p4 = scmp.ge.s32.totalorder %s3075_s18, 2 }
   0x9   : > { %s3077_s18 = smov (%p27_p4, %s3075_s18), 0  ;;  %155 = sbr.rel (%p152_p3) target bundleno = 388 (0x184), region = 32 }
   0xe   : > { %v1847_v0 = vld [vmem:[%s3025_s1 + $0x2] sm:$0x3]  ;;  %vm531_vm0 = vcmask 1041408   ;;  %p179_p5 = scmp.lt.s32.totalorder %s2264_s13, 1  ;;  %v2341_v2 = vld [vmem:[%s3025_s1] sm:$0x3] }
   0xf   : > { %2181 = vmatprep.subr.msk.bf16.mxu1 %vm531_vm0, %v1847_v0  ;;  %v533_v1 = vsel %vm531_vm0, %v1847_v0, 0  ;;  %2180 = vmatprep.subr.msk.bf16.mxu0 %vm531_vm0, %v1847_v0  ;;  %v2346_v3 = vld [vmem:[%s3025_s1 + $0x4] sm:$0x3]  ;;  %s1932_s25 = sshll.u32 %s2260_s12, 6  ;;  %s1829_s26 = sshll.u32 %s2260_s12, 3  ;;  %vm383_vm1 = vcmask 1040384  }
  0x10   : > { %2179 = vmatpush3.bf16.msra.mxu1 %v533_v1  ;;  %2017 = vmatpush3.bf16.msra.mxu0 %v533_v1  ;;  %s3079_s13 = smov (!%p179_p5, %s2264_s13), 1  ;;  %s1832_s28 = sadd.s32 4294967295, %s1829_s26  ;;  %vm384_vm2 = vsmask.f32 256  ;;  %vm407_vm3 = vsmask.f32 7424 }
  0x11   : > { %2182 = vmatprep.subr.msk.bf16.mxu1 %vm531_vm0, %v2341_v2  ;;  %2183 = vmatprep.subr.msk.bf16.mxu0 %vm531_vm0, %v2346_v3  ;;  %s1930_s27 = sshll.u32 %s3079_s13, 7  ;;  %p216_p6 = scmp.gt.s32.totalorder %s1832_s28, 0  ;;  %vm2372_vm4 = vmand %vm383_vm1, %vm384_vm2  ;;  %vm506_vm5 = vcmask 31744   ;;  %v649_v48 = vsel %vm531_vm0, %v2341_v2, 0  ;;  %v2437_v0 = vld [vmem:[%s3025_s1 + $0x6] sm:$0x3] }
  0x12   : > { %s2360_s4 = scalar_lea.vmem %s3024_s0, %s1930_s27  ;;  %p231_p7 = scmp.gt.s32.totalorder %s2260_s12, 0  ;;  %v816_v1 = vsel %vm531_vm0, %v2346_v3, 0  ;;  %vm764_vm7 = vcmask 1046528   ;;  %vm1712_vm9 = vcmask 130048  }
  0x13   : > { %s2363_s5 = scalar_lea.vmem %s2360_s4, %s1932_s25  ;;  %s3081_s28 = smov (!%p216_p6, %s1832_s28), 0 }
  0x14   : > { %v2230_v4 = vld [vmem:[%s2363_s5 + $0x18] sm:$0xff]   ;;  %v2231_v5 = vld [vmem:[%s2363_s5 + $0x20] sm:$0xff]   ;;  %s1933_s6 = sshll.u32 %s3081_s28, 3  ;;  %v2233_v29 = vld [vmem:[%s2363_s5 + $0x28] sm:$0xff]   ;;  %s223_s9 = sadd.s32 8, %s1829_s26 }
  0x15   : > { %v322_v6 = vshrl.u32 %v2230_v4, 16  ;;  %v325_v7 = vshll.u32 %v2230_v4, 16  ;;  %v2232_v8 = vld [vmem:[%s2363_s5] sm:$0xff]   ;;  %v329_v9 = vshrl.u32 %v2231_v5, 16  ;;  %v332_v10 = vshll.u32 %v2231_v5, 16  ;;  %s220_s7 = scalar_lea.vmem %s2360_s4, %s1933_s6  ;;  %v2234_v42 = vld [vmem:[%s2363_s5 + $0x30] sm:$0xff]  }
  0x16   : > { %v301_v12 = vshrl.u32 %v2232_v8, 16  ;;  %v221_v15 = vld [vmem:[%s220_s7] sm:$0xf]  ;;  %s232_s8 = scalar_select %p231_p7, 1, 0  ;;  %v304_v16 = vshll.u32 %v2232_v8, 16 }
  0x17   : > { %v324_v11 = vrot.slane %v322_v6, 7  ;;  %v331_v14 = vrot.slane %v329_v9, 7  ;;  %v222_v19 = vld [vmem:[%s220_s7 + $0x4] sm:$0xf]  ;;  %v336_v50 = vshrl.u32 %v2233_v29, 16  ;;  %p224_p8 = scmp.lt.s32.totalorder %s223_s9, 15 }
  0x18   : > { %v303_v20 = vrot.slane %v301_v12, 7  ;;  %v233_v24 = vstv %s232_s8  ;;  %v2235_v55 = vld [vmem:[%s2363_s5 + $0x8] sm:$0xff]   ;;  %v339_v59 = vshll.u32 %v2233_v29, 16  ;;  %v343_v63 = vshrl.u32 %v2234_v42, 16  ;;  %p237_p9 = scmp.lt.s32.totalorder %s2260_s12, 1 }
  0x19   : > { %v327_v17 = vor.u32 %v325_v7, %v324_v11  ;;  %v2380_v18 = vsel %vm2372_vm4, %v324_v11, 0  ;;  %v334_v22 = vor.u32 %v332_v10, %v331_v14  ;;  %v2385_v23 = vsel %vm2372_vm4, %v331_v14, 0  ;;  %s3083_s9 = smov (!%p224_p8, %s223_s9), 15  ;;  %v2236_v14 = vld [vmem:[%s2363_s5 + $0x10] sm:$0xff]  }
  0x1a   : > { %v464_v21 = vshll.u32 %v2380_v18, 16  ;;  %v476_v26 = vshll.u32 %v2385_v23, 16  ;;  %vm2392_vm6 = vcmp.eq.s32.totalorder %v233_v24, 1  ;;  %v306_v28 = vor.u32 %v304_v16, %v303_v20  ;;  %s1934_s19 = sshll.u32 %s3083_s9, 3 }
  0x1b   : > { %v2389_v25 = vsel %vm2372_vm4, 0, %v327_v17  ;;  %v2401_v33 = vsel %vm2372_vm4, 0, %v334_v22  ;;  %v235_v37 = vsel %vm2392_vm6, %v221_v15, 0  ;;  %v236_v39 = vsel %vm2392_vm6, %v222_v19, 0  ;;  %s2453_s20 = scalar_lea.vmem %s2360_s4, %s1934_s19 }
  0x1c   : > { %v457_v30 = vshrl.u32 %v2389_v25, 16  ;;  %v459_v31 = vshll.u32 %v2389_v25, 16  ;;  %v466_v32 = vrot.slane %v464_v21, 1  ;;  %v469_v34 = vshrl.u32 %v2401_v33, 16  ;;  %s238_s23 = scalar_select %p237_p9, 1, 0 }
  0x1d   : > { %v471_v35 = vshll.u32 %v2401_v33, 16  ;;  %v478_v36 = vrot.slane %v476_v26, 1  ;;  %v2411_v40 = vsel %vm2372_vm4, 0, %v306_v28  ;;  %v2415_v41 = vsel %vm2372_vm4, %v303_v20, 0 }
  0x1e   : > { %v461_v38 = vrot.slane %v459_v31, 1  ;;  %v1837_v44 = vcombine.low %v235_v37, %v236_v39  ;;  %v421_v45 = vshrl.u32 %v2411_v40, 16  ;;  %v423_v46 = vshll.u32 %v2411_v40, 16 }
  0x1f   : > { %v473_v43 = vrot.slane %v471_v35, 1  ;;  %v428_v49 = vshll.u32 %v2415_v41, 16  ;;  %v338_v58 = vrot.slane %v336_v50, 7  ;;  %v346_v5 = vshll.u32 %v2234_v42, 16 }
  0x20   : > { %v462_v47 = vor.u32 %v461_v38, %v457_v30  ;;  %v294_v52 = vshrl.u32 %v1837_v44, 16  ;;  %v297_v53 = vshll.u32 %v1837_v44, 16  ;;  %v425_v54 = vrot.slane %v423_v46, 1 }
  0x21   : > { %v474_v51 = vor.u32 %v473_v43, %v469_v34  ;;  %v430_v57 = vrot.slane %v428_v49, 1  ;;  %v341_v2 = vor.u32 %v339_v59, %v338_v58  ;;  %v2445_v4 = vsel %vm2372_vm4, %v338_v58, 0 }
  0x22   : > { %v2427_v56 = vsel %vm407_vm3, %v462_v47, %v466_v32  ;;  %v296_v61 = vrot.slane %v294_v52, 7  ;;  %v426_v62 = vor.u32 %v425_v54, %v421_v45  ;;  %v488_v8 = vshll.u32 %v2445_v4, 16 }
  0x23   : > { %2026 = vmatprep.mubr.msk.bf16.mxu1 %vm506_vm5, %v2427_v56  ;;  %v2432_v60 = vsel %vm407_vm3, %v474_v51, %v478_v36  ;;  %v308_v9 = vshrl.u32 %v2235_v55, 16  ;;  %v2461_v11 = vsel %vm2372_vm4, 0, %v341_v2  ;;  %v345_v12 = vrot.slane %v343_v63, 7 }
  0x24   : > { %2027 = vmatmul.mubr.msk.bf16.vlgmr.msra.gmra.mxu1 %vm506_vm5, %v2432_v60  ;;  %v299_v6 = vor.u32 %v297_v53, %v296_v61  ;;  %v2449_v7 = vsel %vm2372_vm4, %v296_v61, 0  ;;  %v2457_v10 = vsel %vm407_vm3, %v426_v62, %v430_v57  ;;  %v481_v16 = vshrl.u32 %v2461_v11, 16 }
  0x25   : > { %2035 = vmatpush3.bf16.msra.mxu1 %v649_v48  ;;  %v416_v3 = vshll.u32 %v2449_v7, 16  ;;  %v483_v17 = vshll.u32 %v2461_v11, 16  ;;  %v490_v19 = vrot.slane %v488_v8, 1  ;;  %v348_v24 = vor.u32 %v346_v5, %v345_v12 }
  0x26   : > { %2184 = vmatprep.subr.msk.bf16.mxu1 %vm531_vm0, %v2437_v0  ;;  %v2468_v15 = vsel %vm2372_vm4, 0, %v299_v6  ;;  %v2476_v27 = vsel %vm2372_vm4, %v345_v12, 0  ;;  %v310_v28 = vrot.slane %v308_v9, 7  ;;  %v311_v29 = vshll.u32 %v2235_v55, 16  ;;  %v1882_v55 = vld [vmem:[%s3025_s1 + $0x8] sm:$0x3] }
  0x27   : > { %v409_v20 = vshrl.u32 %v2468_v15, 16  ;;  %v411_v21 = vshll.u32 %v2468_v15, 16  ;;  %v418_v22 = vrot.slane %v416_v3, 1  ;;  %v485_v26 = vrot.slane %v483_v17, 1  ;;  %v2237_v6 = vld [vmem:[%s2363_s5 + $0x38] sm:$0xff]   ;;  %s1826_s5 = sshll.u32 %s2260_s12, 4 }
  0x28   : > { %v2480_v31 = vsel %vm2372_vm4, 0, %v348_v24  ;;  %v500_v32 = vshll.u32 %v2476_v27, 16  ;;  %v315_v34 = vshrl.u32 %v2236_v14, 16  ;;  %v313_v38 = vor.u32 %v311_v29, %v310_v28  ;;  %p187_p10 = scmp.lt.s32.totalorder %s1826_s5, 31  ;;  %s1827_s12 = sshll.u32 %s3079_s13, 5 }
  0x29   : > { %v413_v30 = vrot.slane %v411_v21, 1  ;;  %v486_v35 = vor.u32 %v485_v26, %v481_v16  ;;  %v493_v36 = vshrl.u32 %v2480_v31, 16  ;;  %v495_v37 = vshll.u32 %v2480_v31, 16  ;;  %v2549_v26 = vld [vmem:[%s3025_s1 + $0xa] sm:$0x3] }
  0x2a   : > { %v502_v42 = vrot.slane %v500_v32, 1  ;;  %v2487_v43 = vsel %vm2372_vm4, %v310_v28, 0  ;;  %v317_v44 = vrot.slane %v315_v34, 7  ;;  %v2494_v47 = vsel %vm2372_vm4, 0, %v313_v38  ;;  %s3085_s5 = smov (!%p187_p10, %s1826_s5), 31 }
  0x2b   : > { %v414_v39 = vor.u32 %v413_v30, %v409_v20  ;;  %v2490_v45 = vsel %vm407_vm3, %v486_v35, %v490_v19  ;;  %v497_v46 = vrot.slane %v495_v37, 1  ;;  %v440_v48 = vshll.u32 %v2487_v43, 16  ;;  %v229_v19 = vld [vmem:[%s2453_s20] sm:$0xf]  ;;  %v230_v20 = vld [vmem:[%s2453_s20 + $0x4] sm:$0xf]  ;;  %s190_s6 = sadd.s32 %s1827_s12, %s3085_s5 }
  0x2c   : > { %2030 = vmatprep.mubr.msk.bf16.mxu1 %vm506_vm5, %v2490_v45  ;;  %v433_v50 = vshrl.u32 %v2494_v47, 16  ;;  %v435_v51 = vshll.u32 %v2494_v47, 16  ;;  %v318_v52 = vshll.u32 %v2236_v14, 16  ;;  %v2505_v54 = vsel %vm2372_vm4, %v317_v44, 0  ;;  %s1828_s13 = sshll.u32 %s190_s6, 3 }
  0x2d   : > { %v419_v49 = vsel %vm407_vm3, %v414_v39, %v418_v22  ;;  %v498_v53 = vor.u32 %v497_v46, %v493_v36  ;;  %v442_v58 = vrot.slane %v440_v48, 1  ;;  %v452_v62 = vshll.u32 %v2505_v54, 16  ;;  %s2918_s11 = scalar_lea.vmem %s3027_s3, %s1828_s13 }
  0x2e   : > { %2018 = vmatprep.mubr.msk.bf16.mxu0 %vm506_vm5, %v419_v49  ;;  %v437_v57 = vrot.slane %v435_v51, 1  ;;  %v320_v59 = vor.u32 %v318_v52, %v317_v44  ;;  %v766_v8 = vrot.slane %v2449_v7, 1  ;;  %v765_v3 = vrot.slane %v2468_v15, 1 }
  0x2f   : > { %2019 = vmatmul.mubr.msk.bf16.vlgmr.msra.gmra.mxu0 %vm506_vm5, %v2457_v10  ;;  %v2514_v61 = vsel %vm407_vm3, %v498_v53, %v502_v42  ;;  %v454_v14 = vrot.slane %v452_v62, 1  ;;  %v350_v17 = vshrl.u32 %v2237_v6, 16  ;;  %v937_v7 = vsel %vm531_vm0, %v2437_v0, 0  ;;  %v1900_v62 = vld [vmem:[%s3025_s1 + $0xc] sm:$0x3] }
  0x30   : > { %2053 = vmatpush3.bf16.msra.mxu0 %v816_v1  ;;  %2031 = vmatmul.mubr.msk.bf16.gmra.mxu1 %vm506_vm5, %v2514_v61  ;;  %v438_v63 = vor.u32 %v437_v57, %v433_v50  ;;  %v2521_v2 = vsel %vm2372_vm4, 0, %v320_v59  ;;  %v767_v21 = vsel %vm764_vm7, %v765_v3, %v766_v8  ;;  %v353_v22 = vshll.u32 %v2237_v6, 16 }
  0x31   : > { %2185 = vmatprep.subr.msk.bf16.mxu0 %vm531_vm0, %v1882_v55  ;;  %v445_v5 = vshrl.u32 %v2521_v2, 16  ;;  %v447_v1 = vshll.u32 %v2521_v2, 16  ;;  %2036 = vmatprep.mubr.msk.bf16.mxu1 %vm506_vm5, %v2468_v15  ;;  %v239_v24 = vstv %s238_s23  ;;  %v352_v28 = vrot.slane %v350_v17, 7 }
  0x32   : > { %v2531_v9 = vsel %vm407_vm3, %v438_v63, %v442_v58  ;;  %vm240_vm8 = vcmp.eq.s32.totalorder %v239_v24, 1  ;;  %v769_v29 = vrot.slane %v2415_v41, 1  ;;  %v768_v32 = vrot.slane %v2411_v40, 1 }
  0x33   : > { %2022 = vmatprep.mubr.msk.bf16.mxu0 %vm506_vm5, %v2531_v9  ;;  %v449_v12 = vrot.slane %v447_v1, 1  ;;  %v241_v0 = vsel %vm240_vm8, %v229_v19, 0  ;;  %v242_v30 = vsel %vm240_vm8, %v230_v20, 0  ;;  %v355_v34 = vor.u32 %v353_v22, %v352_v28 }
  0x34   : > { %v404_v35 = vsel %vm2372_vm4, %v352_v28, 0  ;;  %v1846_v36 = vcombine.low %v241_v0, %v242_v30  ;;  %v771_v41 = vrot.slane %v2494_v47, 1  ;;  %v772_v37 = vrot.slane %v2487_v43, 1 }
  0x35   : > { %v450_v16 = vor.u32 %v449_v12, %v445_v5  ;;  %v1059_v38 = vshll.u32 %v404_v35, 16  ;;  %v1187_v39 = vrot.slane %v404_v35, 1  ;;  %v2568_v42 = vsel %vm2372_vm4, 0, %v355_v34 }
  0x36   : > { %v357_v44 = vshrl.u32 %v1846_v36, 16  ;;  %v360_v46 = vshll.u32 %v1846_v36, 16  ;;  %v1052_v48 = vshrl.u32 %v2568_v42, 16  ;;  %v1054_v49 = vshll.u32 %v2568_v42, 16 }
  0x37   : > { %v2544_v15 = vsel %vm407_vm3, %v450_v16, %v454_v14  ;;  %v1186_v50 = vrot.slane %v2568_v42, 1  ;;  %v2574_v51 = vsel %vm764_vm7, %v768_v32, %v769_v29  ;;  %v1069_v43 = vsel %vm531_vm0, %v1882_v55, 0 }
  0x38   : > { %2023 = vmatmul.mubr.msk.bf16.gmra.mxu0 %vm506_vm5, %v2544_v15  ;;  %2037 = vmatmul.mubr.msk.bf16.vlgmr.msra.gmra.mxu1 %vm506_vm5, %v2411_v40  ;;  %v359_v52 = vrot.slane %v357_v44, 7  ;;  %v2578_v53 = vsel %vm764_vm7, %v771_v41, %v772_v37  ;;  %v1056_v57 = vrot.slane %v1054_v49, 1  ;;  %v1061_v58 = vrot.slane %v1059_v38, 1  ;;  %v1909_v37 = vld [vmem:[%s3025_s1 + $0xe] sm:$0x3] }
  0x39   : > { %2071 = vmatpush3.bf16.msra.mxu1 %v937_v7  ;;  %2054 = vmatprep.mubr.msk.bf16.mxu0 %vm506_vm5, %v767_v21  ;;  %v2581_v59 = vsel %vm764_vm7, %v1186_v50, %v1187_v39  ;;  %v774_v55 = vrot.slane %v2521_v2, 1  ;;  %v775_v3 = vrot.slane %v2505_v54, 1  ;;  %v777_v12 = vrot.slane %v2389_v25, 1 }
  0x3a   : > { %2040 = vmatprep.mubr.msk.bf16.mxu1 %vm506_vm5, %v2494_v47  ;;  %2186 = vmatprep.subr.msk.bf16.mxu1 %vm531_vm0, %v2549_v26  ;;  %v362_v63 = vor.u32 %v360_v46, %v359_v52  ;;  %v405_v5 = vsel %vm2372_vm4, %v359_v52, 0  ;;  %v1057_v1 = vor.u32 %v1056_v57, %v1052_v48  ;;  %v778_v14 = vrot.slane %v2380_v18, 1 }
  0x3b   : > { %v1438_v6 = vshll.u32 %v405_v5, 16  ;;  %v1566_v8 = vrot.slane %v405_v5, 1  ;;  %v2615_v21 = vsel %vm764_vm7, %v774_v55, %v775_v3  ;;  %v780_v29 = vrot.slane %v2401_v33, 1 }
  0x3c   : > { %v2600_v16 = vsel %vm2372_vm4, 0, %v362_v63  ;;  %v2606_v17 = vsel %vm407_vm3, %v1057_v1, %v1061_v58  ;;  %v2618_v22 = vsel %vm764_vm7, %v777_v12, %v778_v14  ;;  %v781_v0 = vrot.slane %v2385_v23, 1 }
  0x3d   : > { %v1431_v19 = vshrl.u32 %v2600_v16, 16  ;;  %v1433_v54 = vshll.u32 %v2600_v16, 16  ;;  %v1565_v20 = vrot.slane %v2600_v16, 1  ;;  %v1440_v18 = vrot.slane %v1438_v6, 1 }
  0x3e   : > { %v783_v30 = vrot.slane %v2461_v11, 1  ;;  %v784_v32 = vrot.slane %v2445_v4, 1  ;;  %v782_v34 = vsel %vm764_vm7, %v780_v29, %v781_v0  ;;  %v786_v23 = vrot.slane %v2480_v31, 1 }
  0x3f   : > { %v1435_v7 = vrot.slane %v1433_v54, 1  ;;  %v2612_v13 = vsel %vm764_vm7, %v1565_v20, %v1566_v8  ;;  %v787_v36 = vrot.slane %v2476_v27, 1  ;;  %v1195_v41 = vsel %vm531_vm0, %v2549_v26, 0  ;;  %v1918_v27 = vld [vmem:[%s3025_s1 + $0x10] sm:$0x3] }
  0x40   : > { %2055 = vmatmul.mubr.msk.bf16.vlgmr.msra.gmra.mxu0 %vm506_vm5, %v2574_v51  ;;  %2041 = vmatmul.mubr.msk.bf16.gmra.mxu1 %vm506_vm5, %v2521_v2  ;;  %v785_v35 = vsel %vm764_vm7, %v783_v30, %v784_v32  ;;  %v1574_v26 = vsel %vm531_vm0, %v1918_v27, 0 }
  0x41   : > { %2089 = vmatpush3.bf16.msra.mxu0 %v1069_v43  ;;  %2058 = vmatprep.mubr.msk.bf16.mxu0 %vm506_vm5, %v2578_v53  ;;  %v1436_v24 = vor.u32 %v1435_v7, %v1431_v19  ;;  %v788_v4 = vsel %vm764_vm7, %v786_v23, %v787_v36 }
  0x42   : > { %2044 = vmatprep.mubr.msk.bf16.mxu1 %vm506_vm5, %v2389_v25  ;;  %2187 = vmatprep.subr.msk.bf16.mxu0 %vm531_vm0, %v1900_v62 }
  0x43   : > { %v2625_v28 = vsel %vm407_vm3, %v1436_v24, %v1440_v18 }
  0x48   : > { %2059 = vmatmul.mubr.msk.bf16.gmra.mxu0 %vm506_vm5, %v2615_v21  ;;  %2045 = vmatmul.mubr.msk.bf16.gmra.mxu1 %vm506_vm5, %v2401_v33 }
  0x49   : > { %2062 = vmatprep.mubr.msk.bf16.mxu0 %vm506_vm5, %v2618_v22  ;;  %2048 = vmatprep.mubr.msk.bf16.mxu1 %vm506_vm5, %v2461_v11 }
  0x50   : > { %2063 = vmatmul.mubr.msk.bf16.gmra.mxu0 %vm506_vm5, %v782_v34  ;;  %2049 = vmatmul.mubr.msk.bf16.gmra.mxu1 %vm506_vm5, %v2480_v31 }
  0x51   : > { %2066 = vmatprep.mubr.msk.bf16.mxu0 %vm506_vm5, %v785_v35  ;;  %2072 = vmatprep.mubr.msk.bf16.mxu1 %vm506_vm5, %v2411_v40  ;;  %v1316_v40 = vsel %vm531_vm0, %v1900_v62, 0 }
  0x58   : > { %2067 = vmatmul.mubr.msk.bf16.gmra.mxu0 %vm506_vm5, %v788_v4  ;;  %2073 = vmatmul.mubr.msk.bf16.vlgmr.msra.gmra.mxu1 %vm506_vm5, %v2494_v47 }
  0x59   : > { %2107 = vmatpush3.bf16.msra.mxu1 %v1195_v41  ;;  %2090 = vmatprep.mubr.msk.bf16.mxu0 %vm506_vm5, %v2457_v10  ;;  %v1448_v10 = vsel %vm531_vm0, %v1909_v37, 0 }
  0x5a   : > { %2076 = vmatprep.mubr.msk.bf16.mxu1 %vm506_vm5, %v2521_v2  ;;  %2188 = vmatprep.subr.msk.bf16.mxu1 %vm531_vm0, %v1909_v37 }
  0x60   : > { %2091 = vmatmul.mubr.msk.bf16.vlgmr.msra.gmra.mxu0 %vm506_vm5, %v2531_v9  ;;  %2077 = vmatmul.mubr.msk.bf16.gmra.mxu1 %vm506_vm5, %v2389_v25 }
  0x61   : > { %2125 = vmatpush3.bf16.msra.mxu0 %v1316_v40  ;;  %2094 = vmatprep.mubr.msk.bf16.mxu0 %vm506_vm5, %v2544_v15 }
  0x62   : > { %2080 = vmatprep.mubr.msk.bf16.mxu1 %vm506_vm5, %v2401_v33  ;;  %2189 = vmatprep.subr.msk.bf16.mxu0 %vm531_vm0, %v1918_v27 }
  0x68   : > { %2095 = vmatmul.mubr.msk.bf16.gmra.mxu0 %vm506_vm5, %v2427_v56  ;;  %2081 = vmatmul.mubr.msk.bf16.gmra.mxu1 %vm506_vm5, %v2461_v11 }
  0x69   : > { %2098 = vmatprep.mubr.msk.bf16.mxu0 %vm506_vm5, %v2432_v60  ;;  %2084 = vmatprep.mubr.msk.bf16.mxu1 %vm506_vm5, %v2480_v31 }
  0x70   : > { %2099 = vmatmul.mubr.msk.bf16.gmra.mxu0 %vm506_vm5, %v2490_v45  ;;  %2085 = vmatmul.mubr.msk.bf16.gmra.mxu1 %vm506_vm5, %v2568_v42 }
  0x71   : > { %2102 = vmatprep.mubr.msk.bf16.mxu0 %vm506_vm5, %v2514_v61  ;;  %2108 = vmatprep.mubr.msk.bf16.mxu1 %vm506_vm5, %v2574_v51 }
  0x78   : > { %2103 = vmatmul.mubr.msk.bf16.gmra.mxu0 %vm506_vm5, %v2606_v17  ;;  %2109 = vmatmul.mubr.msk.bf16.vlgmr.msra.gmra.mxu1 %vm506_vm5, %v2578_v53 }
  0x79   : > { %2143 = vmatpush3.bf16.msra.mxu1 %v1448_v10  ;;  %2126 = vmatprep.mubr.msk.bf16.mxu0 %vm506_vm5, %v2494_v47 }
  0x7a   : > { %2112 = vmatprep.mubr.msk.bf16.mxu1 %vm506_vm5, %v2615_v21 }
  0x80   : > { %2127 = vmatmul.mubr.msk.bf16.vlgmr.msra.gmra.mxu0 %vm506_vm5, %v2521_v2  ;;  %2113 = vmatmul.mubr.msk.bf16.gmra.mxu1 %vm506_vm5, %v2618_v22 }
  0x81   : > { %2161 = vmatpush3.bf16.msra.mxu0 %v1574_v26  ;;  %2130 = vmatprep.mubr.msk.bf16.mxu0 %vm506_vm5, %v2389_v25 }
  0x82   : > { %2116 = vmatprep.mubr.msk.bf16.mxu1 %vm506_vm5, %v782_v34 }
  0x88   : > { %2131 = vmatmul.mubr.msk.bf16.gmra.mxu0 %vm506_vm5, %v2401_v33  ;;  %2117 = vmatmul.mubr.msk.bf16.gmra.mxu1 %vm506_vm5, %v785_v35 }
  0x89   : > { %2134 = vmatprep.mubr.msk.bf16.mxu0 %vm506_vm5, %v2461_v11  ;;  %2120 = vmatprep.mubr.msk.bf16.mxu1 %vm506_vm5, %v788_v4 }
  0x90   : > { %2135 = vmatmul.mubr.msk.bf16.gmra.mxu0 %vm506_vm5, %v2480_v31  ;;  %2121 = vmatmul.mubr.msk.bf16.gmra.mxu1 %vm506_vm5, %v2581_v59 }
  0x91   : > { %2138 = vmatprep.mubr.msk.bf16.mxu0 %vm506_vm5, %v2568_v42  ;;  %2144 = vmatprep.mubr.msk.bf16.mxu1 %vm506_vm5, %v2531_v9 }
  0x98   : > { %2139 = vmatmul.mubr.msk.bf16.gmra.mxu0 %vm506_vm5, %v2600_v16  ;;  %2145 = vmatmul.mubr.msk.bf16.vlgmr.msra.gmra.mxu1 %vm506_vm5, %v2544_v15 }
  0x99   : > { %2162 = vmatprep.mubr.msk.bf16.mxu0 %vm506_vm5, %v2578_v53  ;;  %2148 = vmatprep.mubr.msk.bf16.mxu1 %vm506_vm5, %v2427_v56 }
  0xa0   : > { %2163 = vmatmul.mubr.msk.bf16.vlgmr.msra.gmra.mxu0 %vm506_vm5, %v2615_v21  ;;  %2149 = vmatmul.mubr.msk.bf16.gmra.mxu1 %vm506_vm5, %v2432_v60 }
  0xa1   : > { %2166 = vmatprep.mubr.msk.bf16.mxu0 %vm506_vm5, %v2618_v22  ;;  %2152 = vmatprep.mubr.msk.bf16.mxu1 %vm506_vm5, %v2490_v45 }
  0xa8   : > { %2167 = vmatmul.mubr.msk.bf16.gmra.mxu0 %vm506_vm5, %v782_v34  ;;  %2153 = vmatmul.mubr.msk.bf16.gmra.mxu1 %vm506_vm5, %v2514_v61 }
  0xa9   : > { %2170 = vmatprep.mubr.msk.bf16.mxu0 %vm506_vm5, %v785_v35  ;;  %2156 = vmatprep.mubr.msk.bf16.mxu1 %vm506_vm5, %v2606_v17 }
  0xb0   : > { %2171 = vmatmul.mubr.msk.bf16.gmra.mxu0 %vm506_vm5, %v788_v4  ;;  %2157 = vmatmul.mubr.msk.bf16.gmra.mxu1 %vm506_vm5, %v2625_v28 }
  0xb1   : > { %2174 = vmatprep.mubr.msk.bf16.mxu0 %vm506_vm5, %v2581_v59 }
  0xb8   : > { %2175 = vmatmul.mubr.msk.bf16.gmra.mxu0 %vm506_vm5, %v2612_v13 }
  0xe4   : > { %v2028_v25 = vpop.f32.mrf.mxu1 }
  0xe6   : > { %v601_v33 = vpop.f32.mrf.mxu1 }
  0xe8   : > { %v2029_v56 = vpop.f32.mrf.mxu1 }
  0xea   : > { %v604_v60 = vpop.f32.mrf.mxu1 }
  0xef   : > { %v2020_v11 = vpop.f32.mrf.mxu0 }
  0xf0   : > { %v2032_v45 = vpop.f32.mrf.mxu1 }
  0xf1   : > { %v569_v31 = vpop.f32.mrf.mxu0 }
  0xf2   : > { %v617_v61 = vpop.f32.mrf.mxu1 }
  0xf3   : > { %v2021_v47 = vpop.f32.mrf.mxu0 }
  0xf4   : > { %v2033_v9 = vpop.f32.mrf.mxu1 }
  0xf5   : > { %v572_v2 = vpop.f32.mrf.mxu0 }
  0xf6   : > { %v620_v15 = vpop.f32.mrf.mxu1 }
  0xf8   : > { %v2024_v38 = vpop.f32.mrf.mxu0  ;;  %v2038_v39 = vpop.f32.mrf.mxu1 }
  0xf9   : > { %v694_v42 = vadd.f32 %v2038_v39, %v2020_v11 }
  0xfa   : > { %v585_v44 = vpop.f32.mrf.mxu0  ;;  %v685_v46 = vpop.f32.mrf.mxu1 }
  0xfb   : > { %v686_v48 = vadd.f32 %v685_v46, %v569_v31 }
  0xfc   : > { %v2025_v49 = vpop.f32.mrf.mxu0  ;;  %v2039_v50 = vpop.f32.mrf.mxu1 }
  0xfd   : > { %v697_v51 = vadd.f32 %v2039_v50, %v2021_v47 }
  0xfe   : > { %v588_v43 = vpop.f32.mrf.mxu0  ;;  %v688_v52 = vpop.f32.mrf.mxu1 }
  0xff   : > { %v689_v53 = vadd.f32 %v688_v52, %v572_v2 }
 0x100   : > { %v2056_v57 = vpop.f32.mrf.mxu0  ;;  %v2042_v58 = vpop.f32.mrf.mxu1 }
 0x101   : > { %v2748_v59 = vadd.f32 %v2056_v57, %v694_v42  ;;  %v710_v62 = vadd.f32 %v2042_v58, %v2024_v38 }
 0x102   : > { %v852_v63 = vpop.f32.mrf.mxu0  ;;  %v701_v5 = vpop.f32.mrf.mxu1 }
 0x103   : > { %v2750_v55 = vadd.f32 %v852_v63, %v686_v48  ;;  %v702_v1 = vadd.f32 %v701_v5, %v585_v44 }
 0x104   : > { %v2057_v6 = vpop.f32.mrf.mxu0  ;;  %v2043_v8 = vpop.f32.mrf.mxu1 }
 0x105   : > { %v2752_v3 = vadd.f32 %v2057_v6, %v697_v51  ;;  %v713_v12 = vadd.f32 %v2043_v8, %v2025_v49 }
 0x106   : > { %v855_v14 = vpop.f32.mrf.mxu0  ;;  %v704_v16 = vpop.f32.mrf.mxu1 }
 0x107   : > { %v2754_v17 = vadd.f32 %v855_v14, %v689_v53  ;;  %v705_v19 = vadd.f32 %v704_v16, %v588_v43 }
 0x108   : > { %v2060_v54 = vpop.f32.mrf.mxu0  ;;  %v2046_v20 = vpop.f32.mrf.mxu1 }
 0x109   : > { %v2756_v7 = vadd.f32 %v2060_v54, %v710_v62  ;;  %v726_v18 = vadd.f32 %v2046_v20, %v2028_v25 }
 0x10a   : > { %v868_v13 = vpop.f32.mrf.mxu0  ;;  %v717_v21 = vpop.f32.mrf.mxu1 }
 0x10b   : > { %v2758_v22 = vadd.f32 %v868_v13, %v702_v1  ;;  %v718_v24 = vadd.f32 %v717_v21, %v601_v33 }
 0x10c   : > { %v2061_v28 = vpop.f32.mrf.mxu0  ;;  %v2047_v29 = vpop.f32.mrf.mxu1 }
 0x10d   : > { %v2760_v0 = vadd.f32 %v2061_v28, %v713_v12  ;;  %v729_v30 = vadd.f32 %v2047_v29, %v2029_v56 }
 0x10e   : > { %v871_v32 = vpop.f32.mrf.mxu0  ;;  %v720_v34 = vpop.f32.mrf.mxu1 }
 0x10f   : > { %v2762_v35 = vadd.f32 %v871_v32, %v705_v19  ;;  %v721_v23 = vadd.f32 %v720_v34, %v604_v60 }
 0x110   : > { %v2064_v36 = vpop.f32.mrf.mxu0  ;;  %v2050_v4 = vpop.f32.mrf.mxu1 }
 0x111   : > { %v2764_v41 = vadd.f32 %v2064_v36, %v726_v18  ;;  %v742_v37 = vadd.f32 %v2050_v4, %v2032_v45 }
 0x112   : > { %v884_v40 = vpop.f32.mrf.mxu0  ;;  %v733_v27 = vpop.f32.mrf.mxu1 }
 0x113   : > { %v2766_v10 = vadd.f32 %v884_v40, %v718_v24  ;;  %v734_v26 = vadd.f32 %v733_v27, %v617_v61 }
 0x114   : > { %v2065_v25 = vpop.f32.mrf.mxu0  ;;  %v2051_v33 = vpop.f32.mrf.mxu1 }
 0x115   : > { %v2768_v11 = vadd.f32 %v2065_v25, %v729_v30  ;;  %v745_v56 = vadd.f32 %v2051_v33, %v2033_v9 }
 0x116   : > { %v887_v31 = vpop.f32.mrf.mxu0  ;;  %v736_v47 = vpop.f32.mrf.mxu1 }
 0x117   : > { %v2770_v2 = vadd.f32 %v887_v31, %v721_v23  ;;  %v737_v60 = vadd.f32 %v736_v47, %v620_v15 }
 0x118   : > { %v2068_v38 = vpop.f32.mrf.mxu0  ;;  %v2074_v39 = vpop.f32.mrf.mxu1 }
 0x119   : > { %v2772_v42 = vadd.f32 %v2068_v38, %v742_v37 }
 0x11a   : > { %v900_v45 = vpop.f32.mrf.mxu0  ;;  %v973_v44 = vpop.f32.mrf.mxu1 }
 0x11b   : > { %v2774_v46 = vadd.f32 %v900_v45, %v734_v26 }
 0x11c   : > { %v2069_v48 = vpop.f32.mrf.mxu0  ;;  %v2776_v61 = vpop.f32.mrf.mxu1 }
 0x11d   : > { %3032 = vst [vmem:[#allocation2_spill] sm:$0xff] %v2774_v46  ;;  %v2778_v49 = vadd.f32 %v2069_v48, %v745_v56  ;;  %v1036_v46 = vadd.f32 %v973_v44, %v2750_v55 }
 0x11e   : > { %v903_v50 = vpop.f32.mrf.mxu0  ;;  %v2780_v9 = vpop.f32.mrf.mxu1 }
 0x11f   : > { %3033 = vst [vmem:[#allocation3_spill] sm:$0xff] %v2778_v49  ;;  %v2782_v51 = vadd.f32 %v903_v50, %v737_v60  ;;  %v1038_v49 = vadd.f32 %v2074_v39, %v2748_v59 }
 0x120   : > { %v2092_v43 = vpop.f32.mrf.mxu0  ;;  %v2784_v15 = vpop.f32.mrf.mxu1 }
 0x121   : > { %3034 = vst [vmem:[#allocation4_spill] sm:$0xff] %v2782_v51 }
 0x122   : > { %v1105_v52 = vpop.f32.mrf.mxu0  ;;  %v2786_v53 = vpop.f32.mrf.mxu1 }
 0x123   : > { %v1168_v39 = vadd.f32 %v1105_v52, %v1036_v46 }
 0x124   : > { %v2788_v57 = vpop.f32.mrf.mxu0  ;;  %v2790_v58 = vpop.f32.mrf.mxu1 }
 0x125   : > { %v1043_v52 = vadd.f32 %v2790_v58, %v2760_v0 }
 0x126   : > { %v2792_v62 = vpop.f32.mrf.mxu0  ;;  %v2794_v63 = vpop.f32.mrf.mxu1 }
 0x128   : > { %v2796_v5 = vpop.f32.mrf.mxu0  ;;  %v2798_v1 = vpop.f32.mrf.mxu1 }
 0x12a   : > { %v2800_v6 = vpop.f32.mrf.mxu0  ;;  %v2802_v8 = vpop.f32.mrf.mxu1 }
 0x12c   : > { %v2804_v12 = vpop.f32.mrf.mxu0  ;;  %v2806_v14 = vpop.f32.mrf.mxu1 }
 0x12d   : > { %v1175_v58 = vadd.f32 %v2804_v12, %v1043_v52  ;;  %v1044_v12 = vadd.f32 %v2802_v8, %v2766_v10  ;;  %v1047_v10 = vadd.f32 %v2806_v14, %v2768_v11 }
 0x12e   : > { %v2808_v16 = vpop.f32.mrf.mxu0  ;;  %v2810_v19 = vpop.f32.mrf.mxu1 }
 0x130   : > { %v2812_v54 = vpop.f32.mrf.mxu0  ;;  %v2814_v20 = vpop.f32.mrf.mxu1 }
 0x132   : > { %v2816_v18 = vpop.f32.mrf.mxu0  ;;  %v2818_v13 = vpop.f32.mrf.mxu1 }
 0x133   : > { %3035 = vst [vmem:[#allocation5_spill] sm:$0xff] %v2818_v13 }
 0x134   : > { %v2820_v21 = vpop.f32.mrf.mxu0  ;;  %v2822_v24 = vpop.f32.mrf.mxu1 }
 0x135   : > { %3036 = vst [vmem:[#allocation6_spill] sm:$0xff] %v2822_v24 }
 0x136   : > { %v2824_v28 = vpop.f32.mrf.mxu0  ;;  %v2826_v29 = vpop.f32.mrf.mxu1 }
 0x137   : > { %3037 = vst [vmem:[#allocation7_spill] sm:$0xff] %v2824_v28  ;;  %3038 = vst [vmem:[#allocation8_spill] sm:$0xff] %v2826_v29 }
 0x138   : > { %v2828_v30 = vpop.f32.mrf.mxu0  ;;  %v2110_v32 = vpop.f32.mrf.mxu1 }
 0x139   : > { %3039 = vst [vmem:[#allocation9_spill] sm:$0xff] %v2828_v30 }
 0x13a   : > { %v2830_v34 = vpop.f32.mrf.mxu0  ;;  %v1231_v23 = vpop.f32.mrf.mxu1 }
 0x13b   : > { %3040 = vst [vmem:[#allocation10_spill] sm:$0xff] %v2830_v34 }
 0x13c   : > { %v2832_v36 = vpop.f32.mrf.mxu0  ;;  %v2111_v4 = vpop.f32.mrf.mxu1 }
 0x13d   : > { %3041 = vst [vmem:[#allocation11_spill] sm:$0xff] %v2832_v36 }
 0x13e   : > { %v2834_v37 = vpop.f32.mrf.mxu0  ;;  %v1234_v40 = vpop.f32.mrf.mxu1 }
 0x13f   : > { %3042 = vst [vmem:[#allocation12_spill] sm:$0xff] %v2834_v37 }
 0x140   : > { %v2128_v27 = vpop.f32.mrf.mxu0  ;;  %v2114_v26 = vpop.f32.mrf.mxu1 }
 0x142   : > { %v1352_v25 = vpop.f32.mrf.mxu0  ;;  %v2836_v33 = vpop.f32.mrf.mxu1 }
 0x144   : > { %v2129_v56 = vpop.f32.mrf.mxu0  ;;  %v2838_v31 = vpop.f32.mrf.mxu1 }
 0x146   : > { %v1355_v47 = vpop.f32.mrf.mxu0  ;;  %v2840_v60 = vpop.f32.mrf.mxu1 }
 0x148   : > { %v2842_v38 = vpop.f32.mrf.mxu0  ;;  %v2844_v45 = vpop.f32.mrf.mxu1 }
 0x14a   : > { %v2846_v48 = vpop.f32.mrf.mxu0  ;;  %v2848_v50 = vpop.f32.mrf.mxu1 }
 0x14c   : > { %v2850_v37 = vpop.f32.mrf.mxu0  ;;  %v2852_v36 = vpop.f32.mrf.mxu1 }
 0x14d   : > { %3043 = vst [vmem:[#allocation13_spill] sm:$0xff] %v2852_v36 }
 0x14e   : > { %v2854_v29 = vpop.f32.mrf.mxu0  ;;  %v2856_v51 = vpop.f32.mrf.mxu1 }
 0x14f   : > { %3044 = vst [vmem:[#allocation14_spill] sm:$0xff] %v2856_v51  ;;  %v1170_v51 = vadd.f32 %v2092_v43, %v1038_v49  ;;  %v1042_v49 = vadd.f32 %v2784_v15, %v2756_v7  ;;  %v1294_v43 = vadd.f32 %v1231_v23, %v1168_v39 }
 0x150   : > { %v2858_v34 = vpop.f32.mrf.mxu0  ;;  %v2860_v24 = vpop.f32.mrf.mxu1 }
 0x151   : > { %3045 = vst [vmem:[#allocation15_spill] sm:$0xff] %v2858_v34  ;;  %3046 = vst [vmem:[#allocation16_spill] sm:$0xff] %v2860_v24  ;;  %v1039_v34 = vadd.f32 %v2776_v61, %v2752_v3  ;;  %v1174_v7 = vadd.f32 %v2796_v5, %v1042_v49  ;;  %v1415_v15 = vadd.f32 %v1352_v25, %v1294_v43 }
 0x152   : > { %v2864_v30 = vpop.f32.mrf.mxu0  ;;  %v2866_v13 = vpop.f32.mrf.mxu1  ;;  %v1046_v5 = vadd.f32 %v2798_v1, %v2764_v41 }
 0x153   : > { %3047 = vst [vmem:[#allocation17_spill] sm:$0xff] %v2864_v30  ;;  %3048 = vst [vmem:[#allocation18_spill] sm:$0xff] %v2866_v13  ;;  %v1037_v13 = vadd.f32 %v2780_v9, %v2754_v17  ;;  %v1296_v30 = vadd.f32 %v2110_v32, %v1170_v51  ;;  %v1040_v17 = vadd.f32 %v2786_v53, %v2758_v22 }
 0x154   : > { %v2869_v28 = vpop.f32.mrf.mxu0  ;;  %v2871_v36 = vpop.f32.mrf.mxu1 }
 0x155   : > { %3049 = vst [vmem:[#allocation19_spill] sm:$0xff] %v2871_v36  ;;  %v1171_v36 = vadd.f32 %v2788_v57, %v1039_v34  ;;  %v1169_v46 = vadd.f32 %v2792_v62, %v1037_v13  ;;  %v1417_v9 = vadd.f32 %v2128_v27, %v1296_v30  ;;  %v1041_v62 = vadd.f32 %v2794_v63, %v2762_v35 }
 0x156   : > { %v2875_v24 = vpop.f32.mrf.mxu0  ;;  %v2877_v59 = vpop.f32.mrf.mxu1  ;;  %v1172_v53 = vadd.f32 %v2800_v6, %v1040_v17  ;;  %v1176_v17 = vadd.f32 %v2816_v18, %v1044_v12  ;;  %v1050_v18 = vadd.f32 %v2814_v20, %v2772_v42 }
 0x157   : > { %v1297_v51 = vadd.f32 %v2111_v4, %v1171_v36  ;;  %v1295_v34 = vadd.f32 %v1234_v40, %v1169_v46  ;;  %v1300_v36 = vadd.f32 %v2114_v26, %v1174_v7  ;;  %v2908_v40 = vld [vmem:[%s3026_s2] ss:$0 sm:$0xff]  ;;  %v1173_v26 = vadd.f32 %v2808_v16, %v1041_v62 }
 0x158   : > { %v2881_v55 = vpop.f32.mrf.mxu0  ;;  %v2146_v44 = vpop.f32.mrf.mxu1  ;;  %v1298_v27 = vadd.f32 %v2836_v33, %v1172_v53 }
 0x159   : > { %v1549_v23 = vadd.f32 %v2146_v44, %v1417_v9  ;;  %v1418_v30 = vadd.f32 %v2129_v56, %v1297_v51  ;;  %v1416_v63 = vadd.f32 %v1355_v47, %v1295_v34  ;;  %v1301_v56 = vadd.f32 %v2838_v31, %v1175_v58 }
 0x15a   : > { %v2887_v3 = vpop.f32.mrf.mxu0  ;;  %v1484_v61 = vpop.f32.mrf.mxu1  ;;  %v1421_v33 = vadd.f32 %v2842_v38, %v1300_v36  ;;  %v1178_v44 = vadd.f32 %v2812_v54, %v1046_v5  ;;  %v1299_v8 = vadd.f32 %v2840_v60, %v1173_v26  ;;  %v1419_v43 = vadd.f32 %v2846_v48, %v1298_v27  ;;  %v3054_v36 = vld [vmem:[#allocation15_spill] sm:$0xff]  ;;  %v3057_v27 = vld [vmem:[#allocation6_spill] sm:$0xff] }
 0x15b   : > { %v1547_v0 = vadd.f32 %v1484_v61, %v1415_v15  ;;  %v1045_v54 = vadd.f32 %v2810_v19, %v2770_v2  ;;  %v1422_v9 = vadd.f32 %v2850_v37, %v1301_v56  ;;  %v1302_v2 = vadd.f32 %v2848_v50, %v1176_v17 }
 0x15c   : > { %v2894_v32 = vpop.f32.mrf.mxu0  ;;  %v2147_v57 = vpop.f32.mrf.mxu1  ;;  %v1304_v11 = vadd.f32 %v2844_v45, %v1178_v44  ;;  %v1420_v7 = vadd.f32 %v2854_v29, %v1299_v8  ;;  %v3062_v8 = vld [vmem:[#allocation8_spill] sm:$0xff] }
 0x15d   : > { %v1550_v25 = vadd.f32 %v2147_v57, %v1418_v30  ;;  %v1179_v57 = vadd.f32 %v2820_v21, %v1047_v10  ;;  %v3052_v21 = vld [vmem:[#allocation5_spill] sm:$0xff]  ;;  %v3061_v10 = vld [vmem:[#allocation4_spill] sm:$0xff] }
 0x15e   : > { %v2899_v13 = vpop.f32.mrf.mxu0  ;;  %v1487_v22 = vpop.f32.mrf.mxu1  ;;  %v3053_v30 = vld [vmem:[#allocation13_spill] sm:$0xff] }
 0x15f   : > { %v1548_v16 = vadd.f32 %v1487_v22, %v1416_v63  ;;  %v3051_v22 = vld [vmem:[#allocation2_spill] sm:$0xff]  ;;  %v1305_v42 = vadd.f32 %v3053_v30, %v1179_v57  ;;  %v3056_v63 = vld [vmem:[#allocation3_spill] sm:$0xff] }
 0x160   : > { %v2164_v4 = vpop.f32.mrf.mxu0  ;;  %v2150_v35 = vpop.f32.mrf.mxu1  ;;  %v1048_v53 = vadd.f32 %v3052_v21, %v3051_v22 }
 0x161   : > { %v1675_v6 = vadd.f32 %v2164_v4, %v1549_v23  ;;  %v1553_v46 = vadd.f32 %v2150_v35, %v1421_v33  ;;  %v3050_v23 = vld [vmem:[#allocation7_spill] sm:$0xff]  ;;  %v3055_v4 = vld [vmem:[#allocation9_spill] sm:$0xff] }
 0x162   : > { %v1610_v41 = vpop.f32.mrf.mxu0  ;;  %v1500_v1 = vpop.f32.mrf.mxu1  ;;  %v1177_v62 = vadd.f32 %v3050_v23, %v1045_v54  ;;  %v1182_v35 = vadd.f32 %v3055_v4, %v1050_v18 }
 0x163   : > { %v1698_v47 = vadd.f32 %v2908_v40, %v1675_v6  ;;  %v1673_v39 = vadd.f32 %v1610_v41, %v1547_v0  ;;  %v1551_v52 = vadd.f32 %v1500_v1, %v1419_v43  ;;  %v1425_v0 = vadd.f32 %v3054_v36, %v1304_v11  ;;  %v3059_v41 = vld [vmem:[#allocation17_spill] sm:$0xff] }
 0x164   : > { %v2165_v31 = vpop.f32.mrf.mxu0  ;;  %v2151_v49 = vpop.f32.mrf.mxu1  ;;  %v1051_v6 = vadd.f32 %v3057_v27, %v3056_v63  ;;  %v1423_v1 = vadd.f32 %v3059_v41, %v1302_v2 }
 0x165   : > { %1715 = vst.msk [vmem:[%s2918_s11 + $0x10] sm:$0xff] %vm1712_vm9, %v1698_v47  ;;  %v1696_v38 = vadd.f32 %v2908_v40, %v1673_v39  ;;  %v1676_v61 = vadd.f32 %v2165_v31, %v1550_v25  ;;  %v1554_v34 = vadd.f32 %v2151_v49, %v1422_v9  ;;  %v3058_v25 = vld [vmem:[#allocation14_spill] sm:$0xff]  ;;  %v1049_v31 = vadd.f32 %v3062_v8, %v3061_v10  ;;  %v3063_v49 = vld [vmem:[#allocation16_spill] sm:$0xff] }
 0x166   : > { %v1613_v14 = vpop.f32.mrf.mxu0  ;;  %v1503_v60 = vpop.f32.mrf.mxu1  ;;  %v1303_v26 = vadd.f32 %v3058_v25, %v1177_v62  ;;  %v1308_v43 = vadd.f32 %v3063_v49, %v1182_v35  ;;  %v3065_v9 = vld [vmem:[#allocation18_spill] sm:$0xff] }
 0x167   : > { %1713 = vst.msk [vmem:[%s2918_s11] sm:$0xff] %vm1712_vm9, %v1696_v38  ;;  %v1699_v48 = vadd.f32 %v2908_v40, %v1676_v61  ;;  %v1674_v51 = vadd.f32 %v1613_v14, %v1548_v16  ;;  %v1552_v5 = vadd.f32 %v1503_v60, %v1420_v7  ;;  %v3060_v16 = vld [vmem:[#allocation10_spill] sm:$0xff]  ;;  %v3064_v14 = vld [vmem:[#allocation11_spill] sm:$0xff] }
 0x168   : > { %v2168_v19 = vpop.f32.mrf.mxu0  ;;  %v2154_v45 = vpop.f32.mrf.mxu1  ;;  %v1180_v44 = vadd.f32 %v3060_v16, %v1048_v53  ;;  %v1183_v60 = vadd.f32 %v3064_v14, %v1051_v6  ;;  %v1424_v57 = vadd.f32 %v2875_v24, %v1303_v26  ;;  %v3067_v7 = vld [vmem:[#allocation19_spill] sm:$0xff]  ;;  %v1429_v23 = vadd.f32 %v2881_v55, %v1308_v43 }
 0x169   : > { %1716 = vst.msk [vmem:[%s2918_s11 + $0x18] sm:$0xff] %vm1712_vm9, %v1699_v48  ;;  %v1697_v37 = vadd.f32 %v2908_v40, %v1674_v51  ;;  %v1679_v15 = vadd.f32 %v2168_v19, %v1553_v46  ;;  %v1557_v39 = vadd.f32 %v2154_v45, %v1425_v0  ;;  %v1426_v46 = vadd.f32 %v2869_v28, %v1305_v42  ;;  %v3066_v19 = vld [vmem:[#allocation12_spill] sm:$0xff] }
 0x16a   : > { %v1626_v20 = vpop.f32.mrf.mxu0  ;;  %v1516_v50 = vpop.f32.mrf.mxu1  ;;  %v1306_v48 = vadd.f32 %v3065_v9, %v1180_v44  ;;  %v1181_v45 = vadd.f32 %v3066_v19, %v1049_v31 }
 0x16b   : > { %1714 = vst.msk [vmem:[%s2918_s11 + $0x8] sm:$0xff] %vm1712_vm9, %v1697_v37  ;;  %v1702_v29 = vadd.f32 %v2908_v40, %v1679_v15  ;;  %v1677_v58 = vadd.f32 %v1626_v20, %v1551_v52  ;;  %v1555_v11 = vadd.f32 %v1516_v50, %v1423_v1  ;;  %v1309_v37 = vadd.f32 %v3067_v7, %v1183_v60 }
 0x16c   : > { %v2169_v12 = vpop.f32.mrf.mxu0  ;;  %v2155_v56 = vpop.f32.mrf.mxu1  ;;  %v1307_v21 = vadd.f32 %v2877_v59, %v1181_v45  ;;  %v1427_v42 = vadd.f32 %v2887_v3, %v1306_v48 }
 0x16d   : > { %1719 = vst.msk [vmem:[%s2918_s11 + $0x30] sm:$0xff] %vm1712_vm9, %v1702_v29  ;;  %v1700_v33 = vadd.f32 %v2908_v40, %v1677_v58  ;;  %v1680_v47 = vadd.f32 %v2169_v12, %v1554_v34  ;;  %v1558_v2 = vadd.f32 %v2155_v56, %v1426_v46  ;;  %v1430_v0 = vadd.f32 %v2894_v32, %v1309_v37 }
 0x16e   : > { %v1629_v38 = vpop.f32.mrf.mxu0  ;;  %v1519_v61 = vpop.f32.mrf.mxu1  ;;  %v1428_v3 = vadd.f32 %v2899_v13, %v1307_v21 }
 0x16f   : > { %1717 = vst.msk [vmem:[%s2918_s11 + $0x20] sm:$0xff] %vm1712_vm9, %v1700_v33  ;;  %v1703_v17 = vadd.f32 %v2908_v40, %v1680_v47  ;;  %v1678_v54 = vadd.f32 %v1629_v38, %v1552_v5  ;;  %v1556_v22 = vadd.f32 %v1519_v61, %v1424_v57 }
 0x170   : > { %v2172_v51 = vpop.f32.mrf.mxu0  ;;  %v2158_v52 = vpop.f32.mrf.mxu1 }
 0x171   : > { %1720 = vst.msk [vmem:[%s2918_s11 + $0x38] sm:$0xff] %vm1712_vm9, %v1703_v17  ;;  %v1701_v18 = vadd.f32 %v2908_v40, %v1678_v54  ;;  %v1683_v28 = vadd.f32 %v2172_v51, %v1557_v39  ;;  %v1561_v55 = vadd.f32 %v2158_v52, %v1429_v23 }
 0x172   : > { %v1642_v15 = vpop.f32.mrf.mxu0  ;;  %v1532_v34 = vpop.f32.mrf.mxu1 }
 0x173   : > { %1718 = vst.msk [vmem:[%s2918_s11 + $0x28] sm:$0xff] %vm1712_vm9, %v1701_v18  ;;  %v1706_v24 = vadd.f32 %v2908_v40, %v1683_v28  ;;  %v1681_v62 = vadd.f32 %v1642_v15, %v1555_v11  ;;  %v1559_v58 = vadd.f32 %v1532_v34, %v1427_v42 }
 0x174   : > { %v2173_v53 = vpop.f32.mrf.mxu0  ;;  %v2159_v30 = vpop.f32.mrf.mxu1 }
 0x175   : > { %1723 = vst.msk [vmem:[%s2918_s11 + $0x50] sm:$0xff] %vm1712_vm9, %v1706_v24  ;;  %v1704_v20 = vadd.f32 %v2908_v40, %v1681_v62  ;;  %v1684_v50 = vadd.f32 %v2173_v53, %v1558_v2  ;;  %v1562_v27 = vadd.f32 %v2159_v30, %v1430_v0 }
 0x176   : > { %v1645_v36 = vpop.f32.mrf.mxu0  ;;  %v1535_v4 = vpop.f32.mrf.mxu1 }
 0x177   : > { %1721 = vst.msk [vmem:[%s2918_s11 + $0x40] sm:$0xff] %vm1712_vm9, %v1704_v20  ;;  %v1707_v29 = vadd.f32 %v2908_v40, %v1684_v50  ;;  %v1682_v59 = vadd.f32 %v1645_v36, %v1556_v22  ;;  %v1560_v26 = vadd.f32 %v1535_v4, %v1428_v3 }
 0x178   : > { %v2176_v5 = vpop.f32.mrf.mxu0 }
 0x179   : > { %1724 = vst.msk [vmem:[%s2918_s11 + $0x58] sm:$0xff] %vm1712_vm9, %v1707_v29  ;;  %v1705_v35 = vadd.f32 %v2908_v40, %v1682_v59  ;;  %v1687_v63 = vadd.f32 %v2176_v5, %v1561_v55 }
 0x17a   : > { %v1658_v32 = vpop.f32.mrf.mxu0 }
 0x17b   : > { %1722 = vst.msk [vmem:[%s2918_s11 + $0x48] sm:$0xff] %vm1712_vm9, %v1705_v35  ;;  %v1710_v6 = vadd.f32 %v2908_v40, %v1687_v63  ;;  %v1685_v25 = vadd.f32 %v1658_v32, %v1559_v58 }
 0x17c   : > { %v2177_v12 = vpop.f32.mrf.mxu0 }
 0x17d   : > { %1727 = vst.msk [vmem:[%s2918_s11 + $0x70] sm:$0xff] %vm1712_vm9, %v1710_v6  ;;  %v1708_v13 = vadd.f32 %v2908_v40, %v1685_v25  ;;  %v1688_v56 = vadd.f32 %v2177_v12, %v1562_v27 }
 0x17e   : > { %v1661_v41 = vpop.f32.mrf.mxu0 }
 0x17f   : > { %1725 = vst.msk [vmem:[%s2918_s11 + $0x60] sm:$0xff] %vm1712_vm9, %v1708_v13  ;;  %v1711_v1 = vadd.f32 %v2908_v40, %v1688_v56  ;;  %v1686_v33 = vadd.f32 %v1661_v41, %v1560_v26 }
 0x181   : > { %1728 = vst.msk [vmem:[%s2918_s11 + $0x78] sm:$0xff] %vm1712_vm9, %v1711_v1  ;;  %v1709_v47 = vadd.f32 %v2908_v40, %v1686_v33 }
 0x183   : > { %1726 = vst.msk [vmem:[%s2918_s11 + $0x68] sm:$0xff] %vm1712_vm9, %v1709_v47 }
 0x184 PF: > { %s13_s16 = sadd.s32 1, %s2276_s16   ;;  %s3068_s12 = smov %s2268_s14 }
 0x185   : > { %p10_p11 = scmp.ge.s32.totalorder %s13_s16, 6   ;;  %s3069_s13 = smov %s2272_s15 }
 0x186   : > { %s3070_s14 = smov %s3073_s17  ;;  %s3071_s15 = smov %s3077_s18 }
 0x187   :  { %12 = sbr.rel (!%p10_p11) target bundleno = 3 (0x3), region = 73 }

</bundles_post_ra>
